<compile_context>
chip_gen: v7x
topology: tpu7x:2x2x1
jax: 0.10.0
libtpu: 0.0.40
codegen_flags: <defaults>
</compile_context>

<pallas_src>
import math
import jax
import jax.numpy as jnp
from jax.experimental import pallas as pl
from jax.experimental.pallas import tpu as pltpu

_SQRT_2_OVER_PI = math.sqrt(2.0 / math.pi)
_INV_SQRT_2 = 1.0 / math.sqrt(2.0)


def _gelu_tanh_kernel(x_ref, o_ref):
    # Single upcast: keeps VALU work minimal on v5e (no bf16 VPU/EUP path).
    x = x_ref[...].astype(jnp.float32)
    inner = _SQRT_2_OVER_PI * (x + 0.044715 * (x * x * x))
    cdf = 0.5 * (1.0 + jnp.tanh(inner))  # tanh rides the EUP slot -> VALU stays free
    o_ref[...] = (x * cdf).astype(o_ref.dtype)


def _gelu_erf_kernel(x_ref, o_ref):
    x = x_ref[...].astype(jnp.float32)
    o_ref[...] = (x * 0.5 * (jax.lax.erf(x * _INV_SQRT_2) + 1.0)).astype(o_ref.dtype)


def gelu_pallas(x, approximate=True, block_rows=4096, inplace=False):
    """Elementwise GELU matching the PyTorch module's forward pass.

    inplace=True adds input_output_aliases={0:0}; only use it when the caller
    does not need `x` after the call (otherwise XLA inserts a defensive copy).
    """
    orig_shape = x.shape
    orig_dtype = x.dtype
    n = x.size
    lanes = 128
    itemsize = jnp.dtype(orig_dtype).itemsize

    # --- lane-dense 2D slab, no extra HBM passes beyond an optional tiny pad ---
    x_flat = x.reshape(-1)
    pad = (-n) % lanes                       # at most 127 elements
    if pad:
        x_flat = jnp.pad(x_flat, (0, pad))   # GELU(0) = 0, so zero pad is safe
    rows = (n + pad) // lanes
    x2d = x_flat.reshape(rows, lanes)

    # --- block sizing: big blocks, sublane-aligned (8 for 32-bit, 16 for bf16) ---
    sublane = max(8, 32 // max(1, itemsize))
    if block_rows >= rows:
        tm = rows                            # full dim -> always a legal block shape
    else:
        tm = max(sublane, (min(block_rows, rows) // sublane) * sublane)
    grid_rows = pl.cdiv(rows, tm)            # ragged edge block is masked by Pallas

    kernel = _gelu_tanh_kernel if approximate else _gelu_erf_kernel

    cost = pl.CostEstimate(
        flops=10 * n,
        transcendentals=n,
        bytes_accessed=2 * n * itemsize,
    )

    out2d = pl.pallas_call(
        kernel,
        out_shape=jax.ShapeDtypeStruct((rows, lanes), orig_dtype),
        grid_spec=pltpu.PrefetchScalarGridSpec(
            num_scalar_prefetch=0,
            grid=(grid_rows,),
            in_specs=[pl.BlockSpec((tm, lanes), lambda i: (i, 0))],
            out_specs=pl.BlockSpec((tm, lanes), lambda i: (i, 0)),
        ),
        compiler_params=pltpu.CompilerParams(
            dimension_semantics=("parallel",),   # shards across v7x's 2 TCs
        ),
        cost_estimate=cost,
        input_output_aliases=({0: 0} if inplace else {}),
    )(x2d)

    out_flat = out2d.reshape(-1)
    if pad:
        out_flat = out_flat[:n]
    return out_flat.reshape(orig_shape)


def _gelu_ref(x, approximate=True):
    xf = x.astype(jnp.float32)
    if approximate:
        cdf = 0.5 * (1.0 + jnp.tanh(_SQRT_2_OVER_PI * (xf + 0.044715 * xf**3)))
        out = xf * cdf
    else:
        out = xf * (jax.lax.erf(xf * _INV_SQRT_2) + 1.0) * 0.5
    return out.astype(x.dtype)


if __name__ == "__main__":
    key = jax.random.PRNGKey(0)

    # NCHW input, like the vision transformer context
    x = jax.random.normal(key, (2, 4, 16, 16), dtype=jnp.float32)

    # approximate=True (module default)
    out_approx = gelu_pallas(x, approximate=True)
    jax.block_until_ready(out_approx)
    assert jnp.allclose(out_approx, _gelu_ref(x, approximate=True), atol=1e-5, rtol=1e-5)

    # approximate=False (exact erf path)
    out_exact = gelu_pallas(x, approximate=False)
    jax.block_until_ready(out_exact)
    assert jnp.allclose(out_exact, _gelu_ref(x, approximate=False), atol=1e-5, rtol=1e-5)

    # non-128-divisible element count -> exercises the (tiny) lane-pad path
    x_odd = jax.random.normal(jax.random.PRNGKey(1), (3, 5, 7, 11), dtype=jnp.float32)
    out_odd = gelu_pallas(x_odd, approximate=True)
    jax.block_until_ready(out_odd)
    assert jnp.allclose(out_odd, _gelu_ref(x_odd, approximate=True), atol=1e-5, rtol=1e-5)

    # bf16 input -> kernel upcasts to f32 internally (v5e-friendly), stores bf16
    x_bf16 = jax.random.normal(jax.random.PRNGKey(2), (2, 4, 16, 16), dtype=jnp.bfloat16)
    out_bf16 = gelu_pallas(x_bf16, approximate=True)
    jax.block_until_ready(out_bf16)
    assert jnp.allclose(
        out_bf16.astype(jnp.float32),
        _gelu_ref(x_bf16, approximate=True).astype(jnp.float32),
        atol=1e-2, rtol=1e-2,
    )

    print("KERNEL_OK")
</pallas_src>

<mosaic_0001>
module attributes {stable_mosaic.version = 11 : i64} {
  func.func @_gelu_tanh_kernel(%arg0: i32, %arg1: memref<16x128xf32, #tpu.memory_space<vmem>>, %arg2: memref<16x128xf32, #tpu.memory_space<vmem>>) attributes {dimension_semantics = [#tpu.dimension_semantics<parallel>], iteration_bounds = array<i64: 1>, scalar_prefetch = 0 : i64, scratch_operands = 0 : i64, tpu.core_type = #tpu.core_type<tc>, window_params = [{transform_indices = @transform_0, window_bounds = array<i64: 16, 128>}, {transform_indices = @transform_1, window_bounds = array<i64: 16, 128>}]} {
    %c0 = arith.constant 0 : index
    %c0_0 = arith.constant 0 : index
    %0 = vector.load %arg1[%c0, %c0_0] : memref<16x128xf32, #tpu.memory_space<vmem>>, vector<16x128xf32>
    %1 = arith.mulf %0, %0 : vector<16x128xf32>
    %2 = arith.mulf %1, %0 : vector<16x128xf32>
    %cst = arith.constant 4.471500e-02 : f32
    %3 = vector.broadcast %cst : f32 to vector<16x128xf32>
    %4 = arith.mulf %3, %2 : vector<16x128xf32>
    %5 = arith.addf %0, %4 : vector<16x128xf32>
    %cst_1 = arith.constant 0.797884583 : f32
    %6 = vector.broadcast %cst_1 : f32 to vector<16x128xf32>
    %7 = arith.mulf %6, %5 : vector<16x128xf32>
    %8 = math.tanh %7 : vector<16x128xf32>
    %cst_2 = arith.constant 1.000000e+00 : f32
    %9 = vector.broadcast %cst_2 : f32 to vector<16x128xf32>
    %10 = arith.addf %9, %8 : vector<16x128xf32>
    %cst_3 = arith.constant 5.000000e-01 : f32
    %11 = vector.broadcast %cst_3 : f32 to vector<16x128xf32>
    %12 = arith.mulf %11, %10 : vector<16x128xf32>
    %13 = arith.mulf %0, %12 : vector<16x128xf32>
    %c0_4 = arith.constant 0 : index
    %c0_5 = arith.constant 0 : index
    %14 = vector.load %arg2[%c0_4, %c0_5] : memref<16x128xf32, #tpu.memory_space<vmem>>, vector<16x128xf32>
    tpu.vector_store %arg2[%c0_4, %c0_5], %13 {strides = array<i32>} : memref<16x128xf32, #tpu.memory_space<vmem>>, vector<16x128xf32>,
    return
  }
  func.func @transform_0(%arg0: i32) -> (i32, i32) {
    %c0_i32 = arith.constant 0 : i32
    %c0_i32_0 = arith.constant 0 : i32
    return %arg0, %c0_i32 : i32, i32
  }
  func.func @transform_1(%arg0: i32) -> (i32, i32) {
    %c0_i32 = arith.constant 0 : i32
    %c0_i32_0 = arith.constant 0 : i32
    return %arg0, %c0_i32 : i32, i32
  }
}

</mosaic_0001>

<bundles_post_ra>
// kernel: tpu_custom_call.1
= control target key start
LH: loop header
LB: loop body
LE: loop exit
PB: predicated region body
PF: predicated region fallthrough
CT: control target
= control target key end

     0   :  { %6 = vsyncpa [#allocation3], 0  ;;  %s162_s0 = inlined_call_operand.hbm [shape: f32[16,128], index: 0, kind: input, shape index: {}]   ;;  %s163_s1 = inlined_call_operand.hbm [shape: f32[16,128], index: 1, kind: output, shape index: {}]  }
   0x1   :  { %7 = vsyncpa [#allocation4], 0  ;;  %s118_s6 = smov [#allocation2]   ;;  %s70_s10 = scalar_lea.hbm %s162_s0, 256 }
   0x2   :  { %s13_s7 = sshll.u32 %s118_s6, 4  ;;  %p71_p0 = scmp.ne.s32.totalorder %s162_s0, %s70_s10  ;;  %s14_s7 = int_to_ptr.vmem [resolvable:$true] %s13_s7 }
   0x3   :  { %p74_p1 = scmp.lt.u32.totalorder %s70_s10, %s162_s0 }
   0x5   :  { %p76_p2 = pnand %p74_p1, %p71_p0 }
   0x7   :  { %79 = shalt.err (!%p76_p2)
}
   0x8   :  { %s80_s15 = scalar_lea.vmem %s14_s7, 256  ;;  %p85_p4 = scmp.lt.s32.totalorder %s14_s7, %s14_s7 }
   0x9   :  { %p81_p3 = scmp.ne.s32.totalorder %s14_s7, %s80_s15  ;;  %p86_p5 = scmp.lt.s32.totalorder %s80_s15, %s80_s15 }
   0xb   :  { %p87_p6 = por %p86_p5, %p85_p4 }
   0xd   :  { %p88_p7 = pnand %p87_p6, %p81_p3 }
   0xf   :  { %91 = shalt.err (!%p88_p7)
}
  0x10   :  { %s119_s16 = smov 128   ;;  %s120_s17 = smov 8  }
  0x11   :  { %19 = dma.hbm_to_vmem [thread:$0]  %s162_s0, 256, %s14_s7, [#allocation3], %s119_s16, %s119_s16, %s120_s17  }
  0x12   :  { %114 = dma.done.wait [#allocation3], 256  }
  0x13   :  { %115 = vsyncadd [#allocation3], 4294967040  ;;  %v23_v0 = vld [vmem:[#allocation2] sm:$0xff]  ;;  %v24_v1 = vld [vmem:[#allocation2 + $0x8] sm:$0xff]  ;;  %s121_s0 = smov [#allocation5]  }
  0x14   :  { %v25_v2 = vmul.f32 %v23_v0, %v23_v0  ;;  %v26_v3 = vmul.f32 %v24_v1, %v24_v1  ;;  %s50_s20 = sshll.u32 %s121_s0, 4  ;;  %s51_s20 = int_to_ptr.vmem [resolvable:$true] %s50_s20 }
  0x15   :  { %s92_s21 = scalar_lea.vmem %s51_s20, 256  ;;  %p97_p9 = scmp.lt.s32.totalorder %s51_s20, %s51_s20 }
  0x16   :  { %v27_v4 = vmul.f32 %v25_v2, %v23_v0  ;;  %v28_v5 = vmul.f32 %v26_v3, %v24_v1  ;;  %p93_p8 = scmp.ne.s32.totalorder %s51_s20, %s92_s21  ;;  %p98_p10 = scmp.lt.s32.totalorder %s92_s21, %s92_s21 }
  0x18   :  { %v29_v6 = vmul.f32 0.044715, %v27_v4  ;;  %v30_v7 = vmul.f32 0.044715, %v28_v5  ;;  %p99_p11 = por %p98_p10, %p97_p9 }
  0x1a   :  { %v31_v8 = vadd.f32 %v29_v6, %v23_v0  ;;  %v32_v9 = vadd.f32 %v30_v7, %v24_v1  ;;  %p100_p12 = pnand %p99_p11, %p93_p8 }
  0x1c   :  { %v33_v10 = vmul.f32 0.7978846, %v31_v8  ;;  %v34_v11 = vmul.f32 0.7978846, %v32_v9 }
  0x1e   :  { %66 = vtanh.f32 %v33_v10 }
  0x1f   :  { %68 = vtanh.f32 %v34_v11 }
  0x28   :  { %v67_v12 = vpop.eup %66 }
  0x29   :  { %v69_v13 = vpop.eup %68  ;;  %v37_v14 = vadd.f32 1.0, %v67_v12 }
  0x2a   :  { %v38_v15 = vadd.f32 1.0, %v69_v13 }
  0x2b   :  { %v39_v16 = vmul.f32 0.5, %v37_v14 }
  0x2c   :  { %v40_v17 = vmul.f32 0.5, %v38_v15 }
  0x2d   :  { %v41_v18 = vmul.f32 %v39_v16, %v23_v0 }
  0x2e   :  { %v42_v19 = vmul.f32 %v40_v17, %v24_v1 }
  0x2f   :  { %43 = vst [vmem:[#allocation5] sm:$0xff] %v41_v18 }
  0x30   :  { %44 = vst [vmem:[#allocation5 + $0x8] sm:$0xff] %v42_v19 }
  0x31   :  { %103 = shalt.err (!%p100_p12)
}
  0x32   :  { %s104_s24 = scalar_lea.hbm %s163_s1, 256 }
  0x33   :  { %p105_p13 = scmp.ne.s32.totalorder %s163_s1, %s104_s24  ;;  %p108_p0 = scmp.lt.u32.totalorder %s104_s24, %s163_s1 }
  0x35   :  { %p110_p1 = pnand %p108_p0, %p105_p13 }
  0x37   :  { %113 = shalt.err (!%p110_p1)
}
  0x38   :  { %56 = dma.vmem_to_hbm [thread:$0]  %s51_s20, 256, %s163_s1, [#allocation4], %s119_s16, %s119_s16, %s120_s17  }
  0x39   :  { %116 = dma.done.wait [#allocation4], 256  }
  0x3a   :  { %117 = vsyncadd [#allocation4], 4294967040 }
  0x3b   :  { %60 = vsyncpa [#allocation3], 1 }
  0x3c   :  { %61 = vsyncpa [#allocation4], 1 }

</bundles_post_ra>
